<compile_context>
chip_gen: v6e
topology: v6e:2x2x1
jax: 0.10.0
libtpu: 0.0.40
codegen_flags: <defaults>
</compile_context>

<pallas_src>
import numpy as np
import jax
import jax.numpy as jnp
from jax.experimental import pallas as pl
from jax.experimental.pallas import tpu as pltpu

# Small, TPU-friendly shapes consistent with the module's forward.
B, S, H = 2, 16, 128      # batch, bert sequence length, hidden (module default 768, shrunk)
C, L = 8, 16              # max_columns_number, max_table_column_len

NEG_BIG = -1e30           # finite "-inf": keeps empty columns NaN-free


def attention_unit_kernel(cm_ref, cls_ref, mask_ref,
                          w_cat_ref, w_u_ref, b_uv_ref,
                          out_ref, attcol_ref):
    bc, l, h = cm_ref.shape               # (B*C, L, H)
    b = cls_ref.shape[0]
    c = bc // b

    cm = cm_ref[...]                       # (B*C, L, H) bf16
    cls = cls_ref[...]                     # (B, H)      bf16

    # Fused cls-side projection on the MXU: [q | v] = cls @ [W_att | W_v^T].
    qv = jnp.dot(cls, w_cat_ref[...], preferred_element_type=jnp.float32)   # (B, 2H) f32
    q_att = qv[:, :h]                      # q = cls @ W_att  (associativity rewrite)
    v_lin = qv[:, h:]                      # v(cls) without bias

    # One query row per (batch, column) so scoring is a flash-style batched matmul.
    q_rows = jnp.broadcast_to(q_att[:, None, :], (b, c, h)) \
                .reshape(bc, 1, h).astype(cm.dtype)                          # (B*C, 1, H) bf16

    # ---- scoring on the MXU:  aw[r, l] = cm[r, l, :] . q[r // C, :] ----
    # (the cls . b_att term is constant along the softmax axis and cancels)
    aw = jnp.einsum('bqh,blh->bql', q_rows, cm,
                    preferred_element_type=jnp.float32).reshape(bc, l)       # (B*C, L) f32
    aw = aw + mask_ref[...]                # additive mask: 0 valid, NEG_BIG padded

    # ---- masked softmax over L (normalization folded into the pooling) ----
    m = jnp.max(aw, axis=-1, keepdims=True)                                  # (B*C, 1)
    p = jnp.exp(aw - m)                                                      # (B*C, L)
    denom = jnp.sum(p, axis=-1, keepdims=True)                               # (B*C, 1)

    # ---- weighted pooling on the MXU ----
    acc = jnp.einsum('bql,blh->bqh', p.astype(cm.dtype)[:, None, :], cm,
                     preferred_element_type=jnp.float32).reshape(bc, h)      # (B*C, H) f32
    att_cols = acc * pl.reciprocal(denom, approx=True)                       # (B*C, H)

    # ---- out = u(att_columns) + v(cls) ----
    u_out = jnp.dot(att_cols.astype(cm.dtype), w_u_ref[...],
                    preferred_element_type=jnp.float32)                      # (B*C, H)
    out = (u_out + b_uv_ref[...]).reshape(b, c, h) + v_lin[:, None, :]       # (B, C, H)

    out_ref[...] = out.astype(out_ref.dtype)
    attcol_ref[...] = att_cols.reshape(b, c, h).astype(attcol_ref.dtype)


def base_attention_unit(cm_bcl_h, cls_bh, mask_bc_l, w_cat, w_u_t, b_uv):
    bc, l, h = cm_bcl_h.shape
    b = cls_bh.shape[0]
    c = bc // b
    # Whole batch fused into one grid step (overhead-bound at these shapes).
    # TODO(synk): at real sizes (H=768, larger B) cap the fused batch and set
    # vmem_limit_bytes so the block fits v7x's 64 MiB VMEM before re-enabling
    # a megacore ("parallel") batch split.
    return pl.pallas_call(
        attention_unit_kernel,
        out_shape=(jax.ShapeDtypeStruct((b, c, h), jnp.float32),
                   jax.ShapeDtypeStruct((b, c, h), jnp.float32)),
        grid=(1,),
        in_specs=[
            pl.BlockSpec((bc, l, h), lambda i: (0, 0, 0)),    # columns_matrix (bf16)
            pl.BlockSpec((b, h), lambda i: (0, 0)),           # cls (bf16)
            pl.BlockSpec((bc, l), lambda i: (0, 0)),          # additive mask (f32)
            pl.BlockSpec((h, 2 * h), lambda i: (0, 0)),       # [W_att | W_v^T] (bf16)
            pl.BlockSpec((h, h), lambda i: (0, 0)),           # W_u^T (bf16)
            pl.BlockSpec((1, h), lambda i: (0, 0)),           # b_u + b_v (f32)
        ],
        out_specs=(pl.BlockSpec((b, c, h), lambda i: (0, 0, 0)),
                   pl.BlockSpec((b, c, h), lambda i: (0, 0, 0))),
        compiler_params=pltpu.CompilerParams(
            dimension_semantics=("arbitrary",)),
    )(cm_bcl_h, cls_bh, mask_bc_l, w_cat, w_u_t, b_uv)


def build_columns_matrix(tokens_np):
    """Glue: ragged construction of columns_matrix from table/column spans
    (the Python double loop in attention_unit). Deterministic synthetic spans;
    the last two column slots are left empty to exercise the n_cols masking."""
    columns_matrix = np.zeros((B, C, L, H), np.float32)
    lens = np.zeros((B, C), np.int32)
    n_cols = C - 2
    for i in range(B):
        tb = (1, 4)                       # one table span, length 3
        lt = tb[1] - tb[0]
        for k in range(n_cols):
            cl = (4 + k, 4 + k + 1 + (k % 3))
            lc = cl[1] - cl[0]
            columns_matrix[i, k, :lt] = tokens_np[i, tb[0]:tb[1]]
            columns_matrix[i, k, lt:lt + lc] = tokens_np[i, cl[0]:cl[1]]
            lens[i, k] = lt + lc
    return columns_matrix, lens


if __name__ == "__main__":
    key = jax.random.PRNGKey(0)
    keys = jax.random.split(key, 8)

    # TODO(synk): BertEncoder is not defined in the provided source; a random
    # deterministic tensor stands in for its tokens_embeddings output.
    tokens_embeddings = 0.5 * jax.random.normal(keys[0], (B, S, H), jnp.float32)
    cls = tokens_embeddings[:, 0]                     # (B, H)

    columns_matrix_np, lens_np = build_columns_matrix(np.asarray(tokens_embeddings))
    pos = np.arange(L)[None, None, :]
    mask_np = np.where(pos < lens_np[:, :, None], 0.0, NEG_BIG).astype(np.float32)

    # Deterministic Linear params (torch.nn.Linear-style uniform init).
    s = 1.0 / np.sqrt(H)
    w_att = jax.random.uniform(keys[1], (H, H), jnp.float32, -s, s)   # torch (out, in) weight
    b_att = jax.random.uniform(keys[2], (1, H), jnp.float32, -s, s)
    w_u = jax.random.uniform(keys[3], (H, H), jnp.float32, -s, s)
    b_u = jax.random.uniform(keys[4], (1, H), jnp.float32, -s, s)
    w_v = jax.random.uniform(keys[5], (H, H), jnp.float32, -s, s)
    b_v = jax.random.uniform(keys[6], (1, H), jnp.float32, -s, s)
    w_u_t, w_v_t = w_u.T, w_v.T                       # Linear is x @ W^T + b

    # Kernel inputs: bf16 tensors (f32 accumulation), fused weights / biases.
    cm_bcl_h = jnp.asarray(columns_matrix_np).reshape(B * C, L, H).astype(jnp.bfloat16)
    cls_bf = cls.astype(jnp.bfloat16)
    mask_bc_l = jnp.asarray(mask_np.reshape(B * C, L))
    w_cat = jnp.concatenate([w_att, w_v_t], axis=1).astype(jnp.bfloat16)   # (H, 2H)
    w_u_bf = w_u_t.astype(jnp.bfloat16)
    b_uv = b_u + b_v                                                        # (1, H) f32

    out, col_att = base_attention_unit(cm_bcl_h, cls_bf, mask_bc_l, w_cat, w_u_bf, b_uv)
    jax.block_until_ready((cls, out, col_att))        # forward returns (cls, out, col_att)

    # Plain-JAX f32 reference of the original (unrewritten) math on the same
    # bf16-rounded inputs; differences are bf16-precision only.
    cm32 = cm_bcl_h.astype(jnp.float32).reshape(B, C, L, H)
    cls32 = cls_bf.astype(jnp.float32)
    w_att32 = w_att.astype(jnp.bfloat16).astype(jnp.float32)
    w_u32 = w_u_t.astype(jnp.bfloat16).astype(jnp.float32)
    w_v32 = w_v_t.astype(jnp.bfloat16).astype(jnp.float32)

    proj = cm32 @ w_att32.T + b_att
    aw = (cls32[:, None, None, :] * proj).sum(-1)
    aw = jnp.where(jnp.arange(L)[None, None, :] < jnp.asarray(lens_np)[:, :, None],
                   aw, NEG_BIG)
    wsm = jax.nn.softmax(aw, axis=-1)[..., None]
    col_att_ref = (wsm * cm32).sum(2)
    out_ref = col_att_ref @ w_u32 + b_u + (cls32 @ w_v32 + b_v)[:, None, :]

    assert out.shape == (B, C, H) and col_att.shape == (B, C, H)
    assert bool(jnp.all(jnp.isfinite(out))) and bool(jnp.all(jnp.isfinite(col_att)))
    assert jnp.allclose(col_att, col_att_ref, atol=2e-2, rtol=2e-2)
    assert jnp.allclose(out, out_ref, atol=2e-2, rtol=2e-2)
    print("KERNEL_OK")
</pallas_src>

<mosaic_0001>
module attributes {stable_mosaic.version = 11 : i64} {
  func.func @attention_unit_kernel(%arg0: i32, %arg1: memref<16x16x128xbf16, #tpu.memory_space<vmem>>, %arg2: memref<2x128xbf16, #tpu.memory_space<vmem>>, %arg3: memref<16x16xf32, #tpu.memory_space<vmem>>, %arg4: memref<128x256xbf16, #tpu.memory_space<vmem>>, %arg5: memref<128x128xbf16, #tpu.memory_space<vmem>>, %arg6: memref<1x128xf32, #tpu.memory_space<vmem>>, %arg7: memref<2x8x128xf32, #tpu.memory_space<vmem>>, %arg8: memref<2x8x128xf32, #tpu.memory_space<vmem>>) attributes {dimension_semantics = [#tpu.dimension_semantics<arbitrary>], iteration_bounds = array<i64: 1>, scalar_prefetch = 0 : i64, scratch_operands = 0 : i64, tpu.core_type = #tpu.core_type<tc>, window_params = [{pipeline_mode = #tpu.pipeline_mode<synchronous>, transform_indices = @transform_0, window_bounds = array<i64: 16, 16, 128>}, {pipeline_mode = #tpu.pipeline_mode<synchronous>, transform_indices = @transform_1, window_bounds = array<i64: 2, 128>}, {pipeline_mode = #tpu.pipeline_mode<synchronous>, transform_indices = @transform_2, window_bounds = array<i64: 16, 16>}, {pipeline_mode = #tpu.pipeline_mode<synchronous>, transform_indices = @transform_3, window_bounds = array<i64: 128, 256>}, {pipeline_mode = #tpu.pipeline_mode<synchronous>, transform_indices = @transform_4, window_bounds = array<i64: 128, 128>}, {pipeline_mode = #tpu.pipeline_mode<synchronous>, transform_indices = @transform_5, window_bounds = array<i64: 1, 128>}, {pipeline_mode = #tpu.pipeline_mode<synchronous>, transform_indices = @transform_6, window_bounds = array<i64: 2, 8, 128>}, {pipeline_mode = #tpu.pipeline_mode<synchronous>, transform_indices = @transform_7, window_bounds = array<i64: 2, 8, 128>}]} {
    %c0 = arith.constant 0 : index
    %c0_0 = arith.constant 0 : index
    %c0_1 = arith.constant 0 : index
    %0 = vector.load %arg1[%c0, %c0_0, %c0_1] : memref<16x16x128xbf16, #tpu.memory_space<vmem>>, vector<16x16x128xbf16>
    %c0_2 = arith.constant 0 : index
    %c0_3 = arith.constant 0 : index
    %1 = vector.load %arg2[%c0_2, %c0_3] : memref<2x128xbf16, #tpu.memory_space<vmem>>, vector<2x128xbf16>
    %c0_4 = arith.constant 0 : index
    %c0_5 = arith.constant 0 : index
    %2 = vector.load %arg4[%c0_4, %c0_5] : memref<128x256xbf16, #tpu.memory_space<vmem>>, vector<128x256xbf16>
    %cst = arith.constant dense<0.000000e+00> : vector<2x256xf32>
    %3 = tpu.matmul %1, %2, %cst {dimension_numbers = #tpu.dot_dimension_numbers<[1], [0], [0], [1], [0, 0, 1, 1], [], []>} : vector<2x128xbf16>, vector<128x256xbf16>, vector<2x256xf32> -> vector<2x256xf32>
    %4 = vector.extract_strided_slice %3 {offsets = [0, 0], sizes = [2, 128], strides = [1, 1]} : vector<2x256xf32> to vector<2x128xf32>
    %5 = vector.extract_strided_slice %3 {offsets = [0, 128], sizes = [2, 128], strides = [1, 1]} : vector<2x256xf32> to vector<2x128xf32>
    %6 = vector.shape_cast %4 : vector<2x128xf32> to vector<2x1x128xf32>
    %7 = vector.shape_cast %6 : vector<2x1x128xf32> to vector<2x1x128xf32>
    %8 = vector.broadcast %7 : vector<2x1x128xf32> to vector<2x8x128xf32>
    %9 = vector.shape_cast %8 : vector<2x8x128xf32> to vector<16x1x128xf32>
    %10 = arith.truncf %9 : vector<16x1x128xf32> to vector<16x1x128xbf16>
    "tpu.trace_start"() <{level = 10 : i32, message = "bqh,blh->bql"}> : () -> ()
    %cst_6 = arith.constant dense<0.000000e+00> : vector<16x1x16xf32>
    %11 = tpu.matmul %10, %0, %cst_6 {dimension_numbers = #tpu.dot_dimension_numbers<[2], [2], [1], [1], [0, 0, 0, 1, 1, 1], [0], [0]>} : vector<16x1x128xbf16>, vector<16x16x128xbf16>, vector<16x1x16xf32> -> vector<16x1x16xf32>
    "tpu.trace_stop"() : () -> ()
    %12 = vector.shape_cast %11 : vector<16x1x16xf32> to vector<16x16xf32>
    %c0_7 = arith.constant 0 : index
    %c0_8 = arith.constant 0 : index
    %13 = vector.load %arg3[%c0_7, %c0_8] : memref<16x16xf32, #tpu.memory_space<vmem>>, vector<16x16xf32>
    %14 = arith.addf %12, %13 : vector<16x16xf32>
    %cst_9 = arith.constant dense<0xFF800000> : vector<16xf32>
    %15 = vector.multi_reduction <maximumf>, %14, %cst_9 [1] : vector<16x16xf32> to vector<16xf32>
    %16 = vector.shape_cast %15 : vector<16xf32> to vector<16x1xf32>
    %17 = vector.broadcast %16 : vector<16x1xf32> to vector<16x16xf32>
    %18 = arith.subf %14, %17 : vector<16x16xf32>
    %19 = math.exp %18 : vector<16x16xf32>
    %cst_10 = arith.constant dense<0.000000e+00> : vector<16xf32>
    %20 = vector.multi_reduction <add>, %19, %cst_10 [1] : vector<16x16xf32> to vector<16xf32>
    %21 = vector.shape_cast %20 : vector<16xf32> to vector<16x1xf32>
    %22 = arith.truncf %19 : vector<16x16xf32> to vector<16x16xbf16>
    %23 = vector.shape_cast %22 : vector<16x16xbf16> to vector<16x1x16xbf16>
    "tpu.trace_start"() <{level = 10 : i32, message = "bql,blh->bqh"}> : () -> ()
    %cst_11 = arith.constant dense<0.000000e+00> : vector<16x1x128xf32>
    %24 = tpu.matmul %23, %0, %cst_11 {dimension_numbers = #tpu.dot_dimension_numbers<[2], [1], [1], [2], [0, 0, 0, 1, 1, 2], [0], [0]>} : vector<16x1x16xbf16>, vector<16x16x128xbf16>, vector<16x1x128xf32> -> vector<16x1x128xf32>
    "tpu.trace_stop"() : () -> ()
    %25 = vector.shape_cast %24 : vector<16x1x128xf32> to vector<16x128xf32>
    %26 = tpu.reciprocal %21 {approx = true} : vector<16x1xf32> -> vector<16x1xf32>
    %27 = vector.broadcast %26 : vector<16x1xf32> to vector<16x128xf32>
    %28 = arith.mulf %25, %27 : vector<16x128xf32>
    %29 = arith.truncf %28 : vector<16x128xf32> to vector<16x128xbf16>
    %c0_12 = arith.constant 0 : index
    %c0_13 = arith.constant 0 : index
    %30 = vector.load %arg5[%c0_12, %c0_13] : memref<128x128xbf16, #tpu.memory_space<vmem>>, vector<128x128xbf16>
    %cst_14 = arith.constant dense<0.000000e+00> : vector<16x128xf32>
    %31 = tpu.matmul %29, %30, %cst_14 {dimension_numbers = #tpu.dot_dimension_numbers<[1], [0], [0], [1], [0, 0, 1, 1], [], []>} : vector<16x128xbf16>, vector<128x128xbf16>, vector<16x128xf32> -> vector<16x128xf32>
    %c0_15 = arith.constant 0 : index
    %c0_16 = arith.constant 0 : index
    %32 = vector.load %arg6[%c0_15, %c0_16] : memref<1x128xf32, #tpu.memory_space<vmem>>, vector<1x128xf32>
    %33 = vector.broadcast %32 : vector<1x128xf32> to vector<16x128xf32>
    %34 = arith.addf %31, %33 : vector<16x128xf32>
    %35 = vector.shape_cast %34 : vector<16x128xf32> to vector<2x8x128xf32>
    %36 = vector.shape_cast %5 : vector<2x128xf32> to vector<2x1x128xf32>
    %37 = vector.broadcast %36 : vector<2x1x128xf32> to vector<2x8x128xf32>
    %38 = arith.addf %35, %37 : vector<2x8x128xf32>
    %c0_17 = arith.constant 0 : index
    %c0_18 = arith.constant 0 : index
    %c0_19 = arith.constant 0 : index
    %39 = vector.load %arg7[%c0_17, %c0_18, %c0_19] : memref<2x8x128xf32, #tpu.memory_space<vmem>>, vector<2x8x128xf32>
    tpu.vector_store %arg7[%c0_17, %c0_18, %c0_19], %38 {strides = array<i32>} : memref<2x8x128xf32, #tpu.memory_space<vmem>>, vector<2x8x128xf32>,
    %40 = vector.shape_cast %28 : vector<16x128xf32> to vector<2x8x128xf32>
    %c0_20 = arith.constant 0 : index
    %c0_21 = arith.constant 0 : index
    %c0_22 = arith.constant 0 : index
    %41 = vector.load %arg8[%c0_20, %c0_21, %c0_22] : memref<2x8x128xf32, #tpu.memory_space<vmem>>, vector<2x8x128xf32>
    tpu.vector_store %arg8[%c0_20, %c0_21, %c0_22], %40 {strides = array<i32>} : memref<2x8x128xf32, #tpu.memory_space<vmem>>, vector<2x8x128xf32>,
    return
  }
  func.func @transform_0(%arg0: i32) -> (i32, i32, i32) {
    %c0_i32 = arith.constant 0 : i32
    %c0_i32_0 = arith.constant 0 : i32
    %c0_i32_1 = arith.constant 0 : i32
    %c0_i32_2 = arith.constant 0 : i32
    return %c0_i32, %c0_i32_0, %c0_i32_1 : i32, i32, i32
  }
  func.func @transform_1(%arg0: i32) -> (i32, i32) {
    %c0_i32 = arith.constant 0 : i32
    %c0_i32_0 = arith.constant 0 : i32
    %c0_i32_1 = arith.constant 0 : i32
    return %c0_i32, %c0_i32_0 : i32, i32
  }
  func.func @transform_2(%arg0: i32) -> (i32, i32) {
    %c0_i32 = arith.constant 0 : i32
    %c0_i32_0 = arith.constant 0 : i32
    %c0_i32_1 = arith.constant 0 : i32
    return %c0_i32, %c0_i32_0 : i32, i32
  }
  func.func @transform_3(%arg0: i32) -> (i32, i32) {
    %c0_i32 = arith.constant 0 : i32
    %c0_i32_0 = arith.constant 0 : i32
    %c0_i32_1 = arith.constant 0 : i32
    return %c0_i32, %c0_i32_0 : i32, i32
  }
  func.func @transform_4(%arg0: i32) -> (i32, i32) {
    %c0_i32 = arith.constant 0 : i32
    %c0_i32_0 = arith.constant 0 : i32
    %c0_i32_1 = arith.constant 0 : i32
    return %c0_i32, %c0_i32_0 : i32, i32
  }
  func.func @transform_5(%arg0: i32) -> (i32, i32) {
    %c0_i32 = arith.constant 0 : i32
    %c0_i32_0 = arith.constant 0 : i32
    %c0_i32_1 = arith.constant 0 : i32
    return %c0_i32, %c0_i32_0 : i32, i32
  }
  func.func @transform_6(%arg0: i32) -> (i32, i32, i32) {
    %c0_i32 = arith.constant 0 : i32
    %c0_i32_0 = arith.constant 0 : i32
    %c0_i32_1 = arith.constant 0 : i32
    %c0_i32_2 = arith.constant 0 : i32
    return %c0_i32, %c0_i32_0, %c0_i32_1 : i32, i32, i32
  }
  func.func @transform_7(%arg0: i32) -> (i32, i32, i32) {
    %c0_i32 = arith.constant 0 : i32
    %c0_i32_0 = arith.constant 0 : i32
    %c0_i32_1 = arith.constant 0 : i32
    %c0_i32_2 = arith.constant 0 : i32
    return %c0_i32, %c0_i32_0, %c0_i32_1 : i32, i32, i32
  }
}

</mosaic_0001>

<bundles_post_ra>
// kernel: tpu_custom_call.1
= control target key start
LH: loop header
LB: loop body
LE: loop exit
PB: predicated region body
PF: predicated region fallthrough
CT: control target
= control target key end

     0   :  { %13 = vsyncpa [#allocation3], 0  ;;  %s3543_s0 = inlined_call_operand.hbm [shape: bf16[16,16,128], index: 0, kind: input, shape index: {}]   ;;  %s3544_s1 = inlined_call_operand.vmem [shape: bf16[2,128], index: 1, kind: input, shape index: {}]   ;;  %s3545_s2 = inlined_call_operand.hbm [shape: f32[16,16], index: 2, kind: input, shape index: {}]   ;;  %s3546_s3 = inlined_call_operand.hbm [shape: bf16[128,256], index: 3, kind: input, shape index: {}]   ;;  %s3547_s4 = inlined_call_operand.hbm [shape: bf16[128,128], index: 4, kind: input, shape index: {}]   ;;  %s3548_s5 = inlined_call_operand.vmem [shape: f32[1,128], index: 5, kind: input, shape index: {}]   ;;  %s3549_s6 = inlined_call_operand.hbm [shape: f32[2,8,128], index: 6, kind: output, shape index: {0}]   ;;  %s3550_s7 = inlined_call_operand.hbm [shape: f32[2,8,128], index: 7, kind: output, shape index: {1}]  }
   0x1   :  { %14 = vsyncpa [#allocation6], 0 }
   0x2   :  { %15 = vsyncpa [#allocation9], 0 }
   0x3   :  { %16 = vsyncpa [#allocation4], 0 }
   0x4   :  { %17 = vsyncpa [#allocation12], 0  ;;  %s3026_s24 = smov [#allocation5]  }
   0x5   :  { %s37_s25 = sshll.u32 %s3026_s24, 4  ;;  %s38_s25 = int_to_ptr.vmem [resolvable:$true] %s37_s25 }
   0x6   :  { %s2904_s26 = scalar_lea.vmem %s38_s25, 256  ;;  %p2909_p1 = scmp.lt.s32.totalorder %s38_s25, %s38_s25 }
   0x7   :  { %p2905_p0 = scmp.ne.s32.totalorder %s38_s25, %s2904_s26  ;;  %p2910_p2 = scmp.lt.s32.totalorder %s2904_s26, %s2904_s26 }
   0x9   :  { %p2911_p3 = por %p2910_p2, %p2909_p1 }
   0xb   :  { %p2912_p4 = pnand %p2911_p3, %p2905_p0 }
   0xd   :  { %2915 = shalt.err (!%p2912_p4)
}
   0xe   :  { %s3027_s27 = smov 128   ;;  %s3028_s28 = smov 8  }
   0xf   :  { %43 = dma.hbm_to_vmem [thread:$0]  %s3545_s2, 256, %s38_s25, [#allocation6], %s3027_s27, %s3027_s27, %s3028_s28  }
  0x10   :  { %s3029_s8 = smov [#allocation2]  }
  0x11   :  { %s23_s9 = sshll.u32 %s3029_s8, 4  ;;  %s24_s9 = int_to_ptr.vmem [resolvable:$true] %s23_s9 }
  0x12   :  { %s2924_s10 = scalar_lea.vmem %s24_s9, 2048  ;;  %p2929_p6 = scmp.lt.s32.totalorder %s24_s9, %s24_s9 }
  0x13   :  { %p2925_p5 = scmp.ne.s32.totalorder %s24_s9, %s2924_s10  ;;  %p2930_p7 = scmp.lt.s32.totalorder %s2924_s10, %s2924_s10 }
  0x15   :  { %p2931_p8 = por %p2930_p7, %p2929_p6 }
  0x17   :  { %p2932_p9 = pnand %p2931_p8, %p2925_p5 }
  0x19   :  { %2935 = shalt.err (!%p2932_p9)
}
  0x1a   :  { %s3030_s11 = smov 64   ;;  %s3031_s12 = smov 4  }
  0x1b   :  { %29 = dma.hbm_to_vmem [thread:$0]  %s3543_s0, 2048, %s24_s9, [#allocation3], %s3030_s11, %s3030_s11, %s3031_s12  }
  0x1c   :  { %s3032_s15 = smov [#allocation7]   ;;  %s3033_s17 = smov [#allocation8]  }
  0x1d   :  { %s49_s16 = sshll.u32 %s3032_s15, 4  ;;  %s61_s2 = sshll.u32 %s3033_s17, 4  ;;  %s50_s16 = int_to_ptr.vmem [resolvable:$true] %s49_s16  ;;  %s62_s2 = int_to_ptr.vmem [resolvable:$true] %s61_s2 }
  0x1e   :  { %s2944_s18 = scalar_lea.vmem %s50_s16, 2048  ;;  %p2949_p11 = scmp.lt.s32.totalorder %s50_s16, %s50_s16 }
  0x1f   :  { %p2945_p10 = scmp.ne.s32.totalorder %s50_s16, %s2944_s18  ;;  %p2950_p12 = scmp.lt.s32.totalorder %s2944_s18, %s2944_s18 }
  0x21   :  { %p2951_p13 = por %p2950_p12, %p2949_p11 }
  0x23   :  { %p2952_p0 = pnand %p2951_p13, %p2945_p10 }
  0x25   :  { %2955 = shalt.err (!%p2952_p0)
}
  0x26   :  { %55 = dma.hbm_to_vmem [thread:$0]  %s3546_s3, 2048, %s50_s16, [#allocation6], %s3027_s27, %s3027_s27, %s3028_s28  }
  0x27   :  { %s2964_s0 = scalar_lea.vmem %s62_s2, 1024  ;;  %p2969_p2 = scmp.lt.s32.totalorder %s62_s2, %s62_s2 }
  0x28   :  { %p2965_p1 = scmp.ne.s32.totalorder %s62_s2, %s2964_s0  ;;  %p2970_p3 = scmp.lt.s32.totalorder %s2964_s0, %s2964_s0 }
  0x2a   :  { %p2971_p4 = por %p2970_p3, %p2969_p2 }
  0x2c   :  { %p2972_p5 = pnand %p2971_p4, %p2965_p1 }
  0x2e   :  { %2975 = shalt.err (!%p2972_p5)
}
  0x2f   :  { %67 = dma.hbm_to_vmem [thread:$0]  %s3547_s4, 1024, %s62_s2, [#allocation9], %s3030_s11, %s3030_s11, %s3031_s12  }
  0x30   :  { %3016 = dma.done.wait [#allocation3], 2048  }
  0x31   :  { %3017 = vsyncadd [#allocation3], 4294965248 }
  0x32   :  { %3018 = dma.done.wait [#allocation6], 2304  }
  0x33   :  { %3019 = vsyncadd [#allocation6], 4294964992 }
  0x34   :  { %3020 = dma.done.wait [#allocation9], 1024  }
  0x35   :  { %3021 = vsyncadd [#allocation9], 4294966272  ;;  %v3034_v0 = vmov 0   ;;  %v2812_v1 = vld [vmem:[#allocation7 + $0x74] ss:$8 sps:$4 sm:$0xff]   ;;  %v3035_v19 = vmov 0.0   ;;  %v257_v23 = vlaneseq }
  0x36   :  { %244 = vmatprep.mubr.bf16.mxu0 %v3034_v0  ;;  %v2814_v2 = vld [vmem:[#allocation7 + $0x70] ss:$8 sps:$4 sm:$0xff]   ;;  %212 = vmatprep.subr.bf16.mxu0 %v2812_v1  ;;  %v2815_v3 = vld [vmem:[#allocation7 + $0x64] ss:$8 sps:$4 sm:$0xff]   ;;  %v2817_v4 = vld [vmem:[#allocation7 + $0x60] ss:$8 sps:$4 sm:$0xff]  }
  0x37   :  { %213 = vmatpush1.bf16.msra.mxu0 %v2814_v2  ;;  %v2818_v5 = vld [vmem:[#allocation7 + $0x54] ss:$8 sps:$4 sm:$0xff]   ;;  %v2820_v6 = vld [vmem:[#allocation7 + $0x50] ss:$8 sps:$4 sm:$0xff]   ;;  %v2821_v7 = vld [vmem:[#allocation7 + $0x44] ss:$8 sps:$4 sm:$0xff]   ;;  %2586 = vmatprep.subr.bf16.mxu1 %v3035_v19 }
  0x38   :  { %214 = vmatprep.subr.bf16.mxu0 %v2815_v3  ;;  %v2823_v8 = vld [vmem:[#allocation7 + $0x40] ss:$8 sps:$4 sm:$0xff]   ;;  %v2824_v9 = vld [vmem:[#allocation7 + $0x34] ss:$8 sps:$4 sm:$0xff]   ;;  %v2826_v10 = vld [vmem:[#allocation7 + $0x30] ss:$8 sps:$4 sm:$0xff]  }
  0x39   :  { %v2827_v11 = vld [vmem:[#allocation7 + $0x24] ss:$8 sps:$4 sm:$0xff]   ;;  %v2829_v12 = vld [vmem:[#allocation7 + $0x20] ss:$8 sps:$4 sm:$0xff]   ;;  %v2830_v13 = vld [vmem:[#allocation7 + $0x14] ss:$8 sps:$4 sm:$0xff]  }
  0x3a   :  { %v2832_v14 = vld [vmem:[#allocation7 + $0x10] ss:$8 sps:$4 sm:$0xff]   ;;  %v2833_v15 = vld [vmem:[#allocation7 + $0x4] ss:$8 sps:$4 sm:$0xff]   ;;  %v2835_v16 = vld [vmem:[#allocation7] ss:$8 sps:$4 sm:$0xff]  }
  0x3b   :  { %215 = vmatpush1.bf16.msra.mxu0 %v2817_v4  ;;  %v115_v17 = vld [vmem:[%s3544_s1] sm:$0x1]  ;;  %vm3036_vm0 = vmmov 0   ;;  %v3037_v21 = vmov 1966171168   ;;  %v258_v25 = vshrl.u32 %v257_v23, 7 }
  0x3c   :  { %216 = vmatprep.subr.bf16.mxu0 %v2818_v5  ;;  %v3101_v18 = vld [vmem:[#allocation2] sm:$0xff]   ;;  %2588 = vmatprep.mubr.msk.bf16.mxu1 %vm3036_vm0, %v3035_v19  ;;  %v255_v22 = vunpack.c.l.s4 %v3037_v21  ;;  %v3139_v47 = vld [vmem:[#allocation2 + $0x8] sm:$0xff]   ;;  %v3143_v51 = vld [vmem:[#allocation2 + $0x50] sm:$0xff]   ;;  %vm1217_vm1 = vcmask 1041409   ;;  %vm1220_vm2 = vcmask 1042434   ;;  %vm1223_vm3 = vcmask 1043459  }
  0x3d   :  { %2587 = vmatpush3.bf16.xpose.msra.mxu1 %v3101_v18  ;;  %v3106_v20 = vld [vmem:[#allocation2 + $0x40] sm:$0xff]   ;;  %v3118_v29 = vsub.s32 0, %v258_v25  ;;  %v3154_v56 = vld [vmem:[#allocation2 + $0x10] sm:$0xff]   ;;  %v3171_v63 = vld [vmem:[#allocation2 + $0x18] sm:$0xff]   ;;  %vm1226_vm4 = vcmask 1044484   ;;  %vm1229_vm5 = vcmask 1045509  }
  0x3e   :  { %2592 = vmatprep.subr.bf16.mxu1 %v3035_v19  ;;  %v256_v24 = vunpack.c.0.s8 %v255_v22  ;;  %v3156_v58 = vld [vmem:[#allocation2 + $0x60] sm:$0xff]   ;;  %v3173_v1 = vld [vmem:[#allocation2 + $0x70] sm:$0xff]   ;;  %v3214_v23 = vld [vmem:[#allocation2 + $0x48] sm:$0xff]   ;;  %vm1232_vm6 = vcmask 1046534   ;;  %vm1235_vm7 = vcmask 1047559   ;;  %vm1253_vm8 = vcmask 130048  }
  0x3f   :  { %217 = vmatpush1.bf16.msra.mxu0 %v2820_v6  ;;  %v3183_v6 = vld [vmem:[#allocation2 + $0x20] sm:$0xff]   ;;  %s3038_s1 = smov [#allocation11]  }
  0x40   :  { %218 = vmatprep.subr.bf16.mxu0 %v2821_v7  ;;  %v3115_v26 = vsub.s32 %v256_v24, %v258_v25  ;;  %s2438_s23 = sshll.u32 %s3038_s1, 4  ;;  %s2439_s23 = int_to_ptr.vmem [resolvable:$true] %s2438_s23 }
  0x41   :  { %s2976_s24 = scalar_lea.vmem %s2439_s23, 256  ;;  %p2981_p7 = scmp.lt.s32.totalorder %s2439_s23, %s2439_s23 }
  0x42   :  { %p2977_p6 = scmp.ne.s32.totalorder %s2439_s23, %s2976_s24  ;;  %p2982_p8 = scmp.lt.s32.totalorder %s2976_s24, %s2976_s24 }
  0x43   :  { %219 = vmatpush1.bf16.msra.mxu0 %v2823_v8 }
  0x44   :  { %220 = vmatprep.subr.bf16.mxu0 %v2824_v9  ;;  %p2983_p9 = por %p2982_p8, %p2981_p7 }
  0x46   :  { %p2984_p10 = pnand %p2983_p9, %p2977_p6 }
  0x47   :  { %221 = vmatpush1.bf16.msra.mxu0 %v2826_v10 }
  0x48   :  { %222 = vmatprep.subr.bf16.mxu0 %v2827_v11  ;;  %v3195_v11 = vld [vmem:[#allocation2 + $0x28] sm:$0xff]  }
  0x4b   :  { %223 = vmatpush1.bf16.msra.mxu0 %v2829_v12 }
  0x4c   :  { %224 = vmatprep.subr.bf16.mxu0 %v2830_v13 }
  0x4f   :  { %225 = vmatpush1.bf16.msra.mxu0 %v2832_v14 }
  0x50   :  { %226 = vmatprep.subr.bf16.mxu0 %v2833_v15  ;;  %v3202_v15 = vld [vmem:[#allocation2 + $0x30] sm:$0xff]  }
  0x53   :  { %227 = vmatpush1.bf16.msra.mxu0 %v2835_v16 }
  0x54   :  { %2634 = vmatprep.subr.bf16.mxu0 %v3035_v19 }
  0x56   :  { %245 = vmatmul.mubr.bf16.vlgmr.msra.gmra.mxu0 %v115_v17 }
  0x57   :  { %2635 = vmatpush3.bf16.xpose.msra.mxu0 %v3106_v20  ;;  %2636 = vmatprep.mubr.msk.bf16.mxu0 %vm3036_vm0, %v3035_v19 }
  0x58   :  { %2646 = vmatprep.subr.bf16.mxu0 %v3035_v19 }
 0x116   :  { %v246_v27 = vpop.f32.mrf.mxu0 }
 0x117   :  { %v260_v28 = vrot.slane %v246_v27, %v3115_v26 }
 0x118   :  { %v248_v30 = vpop.f32.mrf.mxu0 }
 0x119   :  { %v261_v31 = vcombine.high %v260_v28, %v260_v28  ;;  %v268_v32 = vrot.slane %v260_v28, %v3115_v26  ;;  %v2343_v33 = vrot.slane %v248_v30, %v3115_v26  ;;  %v3223_v28 = vld [vmem:[#allocation2 + $0x58] sm:$0xff]  }
 0x11a   :  { %v250_v34 = vpop.f32.mrf.mxu0 }
 0x11b   :  { %v275_v35 = vrot.slane %v261_v31, %v3115_v26  ;;  %v279_v36 = vrot.slane %v268_v32, %v3118_v29  ;;  %v2344_v37 = vcombine.high %v2343_v33, %v2343_v33  ;;  %v2351_v38 = vrot.slane %v2343_v33, %v3115_v26  ;;  %v3229_v32 = vld [vmem:[#allocation2 + $0x68] sm:$0xff]  }
 0x11c   :  { %v251_v39 = vpop.f32.mrf.mxu0 }
 0x11d   :  { %v283_v40 = vrot.slane %v275_v35, %v3118_v29  ;;  %v291_v41 = vrot.slane %v279_v36, %v3115_v26  ;;  %v3128_v42 = vrot.slane %v2344_v37, %v3115_v26  ;;  %v3131_v43 = vrot.slane %v2351_v38, %v3118_v29 }
 0x11e   :  { %v284_v3 = vcombine.high %v279_v36, %v279_v36  ;;  %v3238_v36 = vld [vmem:[#allocation2 + $0x78] sm:$0xff]  }
 0x11f   :  { %v3134_v44 = vrot.slane %v283_v40, %v3115_v26  ;;  %v307_v45 = vrot.slane %v291_v41, %v3115_v26  ;;  %v2366_v46 = vrot.slane %v3128_v42, %v3118_v29  ;;  %v299_v49 = vcombine.high %v291_v41, %v291_v41 }
 0x120   :  { %v333_v54 = vcombine.high %v283_v40, %v283_v40  ;;  %v298_v7 = vrot.slane %v284_v3, %v3115_v26 }
 0x121   :  { %v356_v48 = vrot.slane %v3134_v44, %v3115_v26  ;;  %v398_v50 = vpack.c.bf16 %v307_v45, %v307_v45  ;;  %v321_v53 = vrot.slane %v299_v49, %v3115_v26  ;;  %v329_v61 = vcombine.high %v307_v45, %v307_v45 }
 0x122   :  { %v3159_v59 = vrot.slane %v333_v54, %v3115_v26  ;;  %v314_v10 = vrot.slane %v298_v7, %v3115_v26  ;;  %v300_v12 = vcombine.high %v298_v7, %v298_v7  ;;  %v348_v24 = vcombine.high %v3134_v44, %v3134_v44 }
 0x123   :  { %v406_v52 = vpack.c.bf16 %v356_v48, %v356_v48  ;;  %2589 = vmatmul.mubr.bf16.vlgmr.msra.gmra.mxu1 %v398_v50  ;;  %v378_v55 = vcombine.high %v356_v48, %v356_v48  ;;  %v399_v57 = vpack.c.bf16 %v321_v53, %v321_v53  ;;  %v400_v0 = vpack.c.bf16 %v329_v61, %v329_v61 }
 0x124   :  { %2593 = vmatpush3.bf16.xpose.msra.mxu1 %v3139_v47  ;;  %2594 = vmatprep.mubr.msk.bf16.mxu1 %vm3036_vm0, %v3035_v19  ;;  %v363_v62 = vrot.slane %v3159_v59, %v3115_v26  ;;  %v331_v4 = vcombine.high %v321_v53, %v321_v53  ;;  %v402_v13 = vpack.c.bf16 %v314_v10, %v314_v10 }
 0x125   :  { %2637 = vmatmul.mubr.bf16.vlgmr.msra.gmra.mxu0 %v406_v52  ;;  %2598 = vmatprep.subr.bf16.mxu1 %v3035_v19  ;;  %v408_v60 = vpack.c.bf16 %v378_v55, %v378_v55  ;;  %v328_v14 = vrot.slane %v300_v12, %v3115_v26  ;;  %v330_v17 = vcombine.high %v314_v10, %v314_v10 }
 0x126   :  { %2647 = vmatpush3.bf16.xpose.msra.mxu0 %v3143_v51  ;;  %2648 = vmatprep.mubr.msk.bf16.mxu0 %vm3036_vm0, %v3035_v19  ;;  %v410_v2 = vpack.c.bf16 %v363_v62, %v363_v62  ;;  %v379_v5 = vcombine.high %v363_v62, %v363_v62  ;;  %v401_v8 = vpack.c.bf16 %v331_v4, %v331_v4 }
 0x127   :  { %2658 = vmatprep.subr.bf16.mxu0 %v3035_v19  ;;  %v403_v16 = vpack.c.bf16 %v328_v14, %v328_v14  ;;  %v404_v21 = vpack.c.bf16 %v330_v17, %v330_v17  ;;  %v332_v22 = vcombine.high %v328_v14, %v328_v14  ;;  %v370_v27 = vrot.slane %v348_v24, %v3115_v26 }
 0x128   :  { %v412_v9 = vpack.c.bf16 %v379_v5, %v379_v5  ;;  %v349_v34 = vcombine.high %v3159_v59, %v3159_v59 }
 0x129   :  { %v405_v25 = vpack.c.bf16 %v332_v22, %v332_v22  ;;  %v407_v30 = vpack.c.bf16 %v370_v27, %v370_v27  ;;  %v380_v31 = vcombine.high %v370_v27, %v370_v27 }
 0x12a   :  { %v377_v35 = vrot.slane %v349_v34, %v3115_v26 }
 0x12b   :  { %2595 = vmatmul.mubr.bf16.vlgmr.msra.gmra.mxu1 %v399_v57  ;;  %v409_v33 = vpack.c.bf16 %v380_v31, %v380_v31 }
 0x12c   :  { %2599 = vmatpush3.bf16.xpose.msra.mxu1 %v3154_v56  ;;  %2600 = vmatprep.mubr.msk.bf16.mxu1 %vm3036_vm0, %v3035_v19  ;;  %v411_v37 = vpack.c.bf16 %v377_v35, %v377_v35  ;;  %v381_v38 = vcombine.high %v377_v35, %v377_v35 }
 0x12d   :  { %2649 = vmatmul.mubr.bf16.vlgmr.msra.gmra.mxu0 %v408_v60  ;;  %2604 = vmatprep.subr.bf16.mxu1 %v3035_v19 }
 0x12e   :  { %2659 = vmatpush3.bf16.xpose.msra.mxu0 %v3156_v58  ;;  %2660 = vmatprep.mubr.msk.bf16.mxu0 %vm3036_vm0, %v3035_v19  ;;  %v413_v39 = vpack.c.bf16 %v381_v38, %v381_v38 }
 0x12f   :  { %2670 = vmatprep.subr.bf16.mxu0 %v3035_v19 }
 0x133   :  { %2601 = vmatmul.mubr.bf16.vlgmr.msra.gmra.mxu1 %v400_v0 }
 0x134   :  { %2605 = vmatpush3.bf16.xpose.msra.mxu1 %v3171_v63  ;;  %2606 = vmatprep.mubr.msk.bf16.mxu1 %vm3036_vm0, %v3035_v19 }
 0x135   :  { %2661 = vmatmul.mubr.bf16.vlgmr.msra.gmra.mxu0 %v410_v2  ;;  %2610 = vmatprep.subr.bf16.mxu1 %v3035_v19 }
 0x136   :  { %2671 = vmatpush3.bf16.xpose.msra.mxu0 %v3173_v1  ;;  %2672 = vmatprep.mubr.msk.bf16.mxu0 %vm3036_vm0, %v3035_v19 }
 0x137   :  { %2682 = vmatprep.subr.bf16.mxu0 %v3035_v19 }
 0x13b   :  { %2607 = vmatmul.mubr.bf16.vlgmr.msra.gmra.mxu1 %v401_v8 }
 0x13c   :  { %2611 = vmatpush3.bf16.xpose.msra.mxu1 %v3183_v6  ;;  %2612 = vmatprep.mubr.msk.bf16.mxu1 %vm3036_vm0, %v3035_v19 }
 0x13d   :  { %2673 = vmatmul.mubr.bf16.vlgmr.msra.gmra.mxu0 %v412_v9  ;;  %2616 = vmatprep.subr.bf16.mxu1 %v3035_v19 }
 0x13e   :  { %2683 = vmatpush3.bf16.msra.mxu0 %v3101_v18  ;;  %2684 = vmatprep.mubr.msk.bf16.mxu0 %vm3036_vm0, %v3035_v19  ;;  %v3208_v18 = vld [vmem:[#allocation2 + $0x38] sm:$0xff]  }
 0x13f   :  { %2694 = vmatprep.subr.bf16.mxu0 %v3035_v19 }
 0x143   :  { %2613 = vmatmul.mubr.bf16.vlgmr.msra.gmra.mxu1 %v402_v13 }
 0x144   :  { %2617 = vmatpush3.bf16.xpose.msra.mxu1 %v3195_v11  ;;  %2618 = vmatprep.mubr.msk.bf16.mxu1 %vm3036_vm0, %v3035_v19 }
 0x145   :  { %2622 = vmatprep.subr.bf16.mxu1 %v3035_v19 }
 0x14b   :  { %2619 = vmatmul.mubr.bf16.vlgmr.msra.gmra.mxu1 %v403_v16 }
 0x14c   :  { %2623 = vmatpush3.bf16.xpose.msra.mxu1 %v3202_v15  ;;  %2624 = vmatprep.mubr.msk.bf16.mxu1 %vm3036_vm0, %v3035_v19 }
 0x14d   :  { %2628 = vmatprep.subr.bf16.mxu1 %v3035_v19 }
 0x153   :  { %2625 = vmatmul.mubr.bf16.vlgmr.msra.gmra.mxu1 %v404_v21 }
 0x154   :  { %2629 = vmatpush3.bf16.xpose.msra.mxu1 %v3208_v18  ;;  %2630 = vmatprep.mubr.msk.bf16.mxu1 %vm3036_vm0, %v3035_v19 }
 0x155   :  { %2640 = vmatprep.subr.bf16.mxu1 %v3035_v19 }
 0x15b   :  { %2631 = vmatmul.mubr.bf16.vlgmr.msra.gmra.mxu1 %v405_v25 }
 0x15c   :  { %2641 = vmatpush3.bf16.xpose.msra.mxu1 %v3214_v23  ;;  %2642 = vmatprep.mubr.msk.bf16.mxu1 %vm3036_vm0, %v3035_v19 }
 0x15d   :  { %2652 = vmatprep.subr.bf16.mxu1 %v3035_v19 }
 0x163   :  { %2643 = vmatmul.mubr.bf16.vlgmr.msra.gmra.mxu1 %v407_v30  ;;  %v1150_v30 = vld [vmem:[#allocation5] sm:$0xff] }
 0x164   :  { %2653 = vmatpush3.bf16.xpose.msra.mxu1 %v3223_v28  ;;  %2654 = vmatprep.mubr.msk.bf16.mxu1 %vm3036_vm0, %v3035_v19  ;;  %v1155_v34 = vrot.slane %v1150_v30, 2  ;;  %v1157_v38 = vrot.slane %v1150_v30, 4 }
 0x165   :  { %2664 = vmatprep.subr.bf16.mxu1 %v3035_v19 }
 0x16b   :  { %2655 = vmatmul.mubr.bf16.vlgmr.msra.gmra.mxu1 %v409_v33  ;;  %v1154_v33 = vrot.slane %v1150_v30, 1 }
 0x16c   :  { %2665 = vmatpush3.bf16.xpose.msra.mxu1 %v3229_v32  ;;  %2666 = vmatprep.mubr.msk.bf16.mxu1 %vm3036_vm0, %v3035_v19 }
 0x16d   :  { %2676 = vmatprep.subr.bf16.mxu1 %v3035_v19 }
 0x173   :  { %2667 = vmatmul.mubr.bf16.vlgmr.msra.gmra.mxu1 %v411_v37  ;;  %v1156_v37 = vrot.slane %v1150_v30, 3 }
 0x174   :  { %2677 = vmatpush3.bf16.xpose.msra.mxu1 %v3238_v36  ;;  %2678 = vmatprep.mubr.msk.bf16.mxu1 %vm3036_vm0, %v3035_v19 }
 0x175   :  { %2688 = vmatprep.subr.bf16.mxu1 %v3035_v19 }
 0x17b   :  { %2679 = vmatmul.mubr.bf16.vlgmr.msra.gmra.mxu1 %v413_v39 }
 0x17c   :  { %2689 = vmatpush3.bf16.msra.mxu1 %v3139_v47  ;;  %2690 = vmatprep.mubr.msk.bf16.mxu1 %vm3036_vm0, %v3035_v19 }
 0x17d   :  { %2700 = vmatprep.subr.bf16.mxu1 %v3035_v19 }
 0x1e3   :  { %v454_v26 = vpop.f32.mrf.mxu1 }
 0x1e5   :  { %v3248_v40 = vpop.f32.mrf.mxu0  ;;  %v2590_v41 = vpop.f32.mrf.mxu1 }
 0x1e7   :  { %v2638_v44 = vpop.f32.mrf.mxu0  ;;  %v457_v45 = vpop.f32.mrf.mxu1 }
 0x1e8   :  { %v1158_v44 = vrot.slane %v1150_v30, 5 }
 0x1e9   :  { %v825_v48 = vpop.f32.mrf.mxu0  ;;  %v2591_v49 = vpop.f32.mrf.mxu1 }
 0x1ea   :  { %v1159_v49 = vrot.slane %v1150_v30, 6 }
 0x1eb   :  { %v2639_v50 = vpop.f32.mrf.mxu0  ;;  %v500_v52 = vpop.f32.mrf.mxu1 }
 0x1ec   :  { %v3256_v41 = vadd.f32 %v1154_v33, %v500_v52 }
 0x1ed   :  { %v3250_v53 = vpop.f32.mrf.mxu0  ;;  %v2596_v54 = vpop.f32.mrf.mxu1 }
 0x1ef   :  { %v2650_v55 = vpop.f32.mrf.mxu0  ;;  %v503_v47 = vpop.f32.mrf.mxu1 }
 0x1f0   :  { %v1216_v47 = vrot.slane %v3256_v41, 7 }
 0x1f1   :  { %v917_v57 = vpop.f32.mrf.mxu0  ;;  %v2597_v59 = vpop.f32.mrf.mxu1 }
 0x1f3   :  { %v2651_v60 = vpop.f32.mrf.mxu0  ;;  %v546_v61 = vpop.f32.mrf.mxu1 }
 0x1f4   :  { %v3258_v45 = vadd.f32 %v1155_v34, %v546_v61  ;;  %v1151_v34 = vld [vmem:[#allocation5 + $0x8] sm:$0xff] }
 0x1f5   :  { %v3252_v62 = vpop.f32.mrf.mxu0  ;;  %v2602_v0 = vpop.f32.mrf.mxu1 }
 0x1f6   :  { %v1219_v59 = vrot.slane %v3258_v45, 6  ;;  %v3270_v0 = vadd.f32 %v1150_v30, %v454_v26 }
 0x1f7   :  { %v2662_v2 = vpop.f32.mrf.mxu0  ;;  %v549_v3 = vpop.f32.mrf.mxu1 }
 0x1f8   :  { %v1160_v2 = vrot.slane %v1150_v30, 7 }
 0x1f9   :  { %v1009_v4 = vpop.f32.mrf.mxu0  ;;  %v2603_v5 = vpop.f32.mrf.mxu1 }
 0x1fa   :  { %v1218_v5 = vsel %vm1217_vm1, %v1216_v47, %v3270_v0 }
 0x1fb   :  { %v2663_v7 = vpop.f32.mrf.mxu0  ;;  %v592_v8 = vpop.f32.mrf.mxu1 }
 0x1fc   :  { %v3260_v50 = vadd.f32 %v1156_v37, %v592_v8  ;;  %v1221_v8 = vsel %vm1220_vm2, %v1219_v59, %v1218_v5  ;;  %v1161_v37 = vrot.slane %v1151_v34, 1  ;;  %v3297_v5 = vadd.f32 %v1151_v34, %v3248_v40 }
 0x1fd   :  { %v3254_v9 = vpop.f32.mrf.mxu0  ;;  %v2608_v10 = vpop.f32.mrf.mxu1 }
 0x1fe   :  { %v1222_v61 = vrot.slane %v3260_v50, 5 }
 0x1ff   :  { %v2674_v12 = vpop.f32.mrf.mxu0  ;;  %v595_v13 = vpop.f32.mrf.mxu1 }
 0x200   :  { %v1224_v12 = vsel %vm1223_vm3, %v1222_v61, %v1221_v8  ;;  %v1165_v61 = vrot.slane %v1151_v34, 5 }
 0x201   :  { %v1101_v14 = vpop.f32.mrf.mxu0  ;;  %v2609_v16 = vpop.f32.mrf.mxu1 }
 0x203   :  { %v2675_v17 = vpop.f32.mrf.mxu0  ;;  %v638_v21 = vpop.f32.mrf.mxu1 }
 0x204   :  { %v3262_v54 = vadd.f32 %v1157_v38, %v638_v21 }
 0x205   :  { %v2614_v22 = vpop.f32.mrf.mxu1 }
 0x206   :  { %v1225_v3 = vrot.slane %v3262_v54, 4 }
 0x207   :  { %v641_v24 = vpop.f32.mrf.mxu1 }
 0x208   :  { %v1227_v14 = vsel %vm1226_vm4, %v1225_v3, %v1224_v12  ;;  %v1164_v3 = vrot.slane %v1151_v34, 4 }
 0x209   :  { %v2615_v25 = vpop.f32.mrf.mxu1 }
 0x20b   :  { %v684_v27 = vpop.f32.mrf.mxu1 }
 0x20c   :  { %v3265_v57 = vadd.f32 %v1158_v44, %v684_v27 }
 0x20d   :  { %v2620_v31 = vpop.f32.mrf.mxu1 }
 0x20e   :  { %v1228_v7 = vrot.slane %v3265_v57, 3 }
 0x20f   :  { %v687_v35 = vpop.f32.mrf.mxu1 }
 0x210   :  { %v1230_v21 = vsel %vm1229_vm5, %v1228_v7, %v1227_v14  ;;  %v3306_v14 = vadd.f32 %v1164_v3, %v3252_v62 }
 0x211   :  { %v2621_v39 = vpop.f32.mrf.mxu1 }
 0x213   :  { %v730_v48 = vpop.f32.mrf.mxu1 }
 0x214   :  { %v3268_v60 = vadd.f32 %v1159_v49, %v730_v48  ;;  %v1163_v48 = vrot.slane %v1151_v34, 3  ;;  %v1162_v49 = vrot.slane %v1151_v34, 2 }
 0x215   :  { %v2626_v55 = vpop.f32.mrf.mxu1 }
 0x216   :  { %v1231_v10 = vrot.slane %v3268_v60, 2 }
 0x217   :  { %v733_v52 = vpop.f32.mrf.mxu1 }
 0x218   :  { %v1233_v24 = vsel %vm1232_vm6, %v1231_v10, %v1230_v21 }
 0x219   :  { %v2627_v4 = vpop.f32.mrf.mxu1 }
 0x21b   :  { %v776_v26 = vpop.f32.mrf.mxu1 }
 0x21c   :  { %v3280_v13 = vadd.f32 %v1160_v2, %v776_v26  ;;  %v3294_v2 = vadd.f32 %v1162_v49, %v3250_v53  ;;  %v1166_v53 = vrot.slane %v1151_v34, 6 }
 0x21d   :  { %v2632_v16 = vpop.f32.mrf.mxu1 }
 0x21e   :  { %v1234_v17 = vrot.slane %v3280_v13, 1  ;;  %v1239_v12 = vrot.slane %v3294_v2, 6 }
 0x21f   :  { %v779_v22 = vpop.f32.mrf.mxu1 }
 0x220   :  { %v1236_v25 = vsel %vm1235_vm7, %v1234_v17, %v1233_v24  ;;  %v1167_v24 = vrot.slane %v1151_v34, 7 }
 0x221   :  { %v2633_v27 = vpop.f32.mrf.mxu1  ;;  %v1254_v30 = vsel %vm1253_vm8, %v1236_v25, -inf  ;;  %v1243_v25 = vrot.slane %v3306_v14, 4 }
 0x222   :  { %1255 = vmax.xlane.f32.xlu0 %v1254_v30  ;;  %v3313_v27 = vadd.f32 %v1166_v53, %v3254_v9 }
 0x223   :  { %v868_v31 = vpop.f32.mrf.mxu1 }
 0x224   :  { %v3288_v44 = vadd.f32 %v1161_v37, %v868_v31  ;;  %v1247_v37 = vrot.slane %v3313_v27, 2 }
 0x225   :  { %v2644_v33 = vpop.f32.mrf.mxu1 }
 0x226   :  { %v1237_v59 = vrot.slane %v3288_v44, 7 }
 0x227   :  { %v871_v35 = vpop.f32.mrf.mxu1 }
 0x228   :  { %v1238_v8 = vsel %vm1217_vm1, %v1237_v59, %v3297_v5 }
 0x229   :  { %v2645_v38 = vpop.f32.mrf.mxu1  ;;  %v1240_v17 = vsel %vm1220_vm2, %v1239_v12, %v1238_v8 }
 0x22b   :  { %v960_v39 = vpop.f32.mrf.mxu1 }
 0x22c   :  { %v3291_v52 = vadd.f32 %v1163_v48, %v960_v39 }
 0x22d   :  { %v2656_v55 = vpop.f32.mrf.mxu1 }
 0x22e   :  { %v1241_v10 = vrot.slane %v3291_v52, 5 }
 0x22f   :  { %v963_v47 = vpop.f32.mrf.mxu1 }
 0x230   :  { %v1242_v40 = vsel %vm1223_vm3, %v1241_v10, %v1240_v17 }
 0x231   :  { %v2657_v4 = vpop.f32.mrf.mxu1  ;;  %v1244_v62 = vsel %vm1226_vm4, %v1243_v25, %v1242_v40 }
 0x233   :  { %v1052_v7 = vpop.f32.mrf.mxu1 }
 0x234   :  { %v3302_v26 = vadd.f32 %v1165_v61, %v1052_v7 }
 0x235   :  { %v2668_v16 = vpop.f32.mrf.mxu1 }
 0x236   :  { %v1245_v22 = vrot.slane %v3302_v26, 3 }
 0x237   :  { %v1055_v21 = vpop.f32.mrf.mxu1 }
 0x238   :  { %v1246_v35 = vsel %vm1229_vm5, %v1245_v22, %v1244_v62 }
 0x239   :  { %v2669_v30 = vpop.f32.mrf.mxu1  ;;  %v1248_v34 = vsel %vm1232_vm6, %v1247_v37, %v1246_v35 }
 0x23b   :  { %v1144_v31 = vpop.f32.mrf.mxu1 }
 0x23c   :  { %v3316_v33 = vadd.f32 %v1167_v24, %v1144_v31 }
 0x23d   :  { %v2680_v38 = vpop.f32.mrf.mxu1 }
 0x23e   :  { %v1249_v39 = vrot.slane %v3316_v33, 1 }
 0x23f   :  { %v1147_v48 = vpop.f32.mrf.mxu1 }
 0x240   :  { %v1250_v49 = vsel %vm1235_vm7, %v1249_v39, %v1248_v34 }
 0x241   :  { %v2681_v9 = vpop.f32.mrf.mxu1  ;;  %v1257_v55 = vsel %vm1253_vm8, %v1250_v49, -inf }
 0x242   :  { %1258 = vmax.xlane.f32.xlu0 %v1257_v55 }
 0x2ab   :  { %v1256_v47 = vpop.xlane.xlu0 %1255 }
 0x2ac   :  { %v1262_v59 = vrot.slane %v1256_v47, 1  ;;  %v1263_v61 = vrot.slane %v1256_v47, 2  ;;  %v1264_v3 = vrot.slane %v1256_v47, 3  ;;  %v1265_v4 = vrot.slane %v1256_v47, 4 }
 0x2ad   :  { %v1266_v7 = vrot.slane %v1256_v47, 5  ;;  %v1267_v8 = vrot.slane %v1256_v47, 6  ;;  %v1268_v10 = vrot.slane %v1256_v47, 7  ;;  %v1292_v12 = vsub.f32 %v3270_v0, %v1256_v47 }
 0x2ae   :  { %v1293_v53 = vsub.f32 %v3256_v41, %v1262_v59  ;;  %v1294_v16 = vsub.f32 %v3258_v45, %v1263_v61  ;;  %v1295_v17 = vsub.f32 %v3260_v50, %v1264_v3  ;;  %v1296_v21 = vsub.f32 %v3262_v54, %v1265_v4 }
 0x2af   :  { %v1297_v40 = vsub.f32 %v3265_v57, %v1266_v7  ;;  %v1298_v22 = vsub.f32 %v3268_v60, %v1267_v8  ;;  %v1308_v24 = vmul.f32 1.442695, %v1292_v12  ;;  %v1299_v62 = vsub.f32 %v3280_v13, %v1268_v10 }
 0x2b0   :  { %v1310_v25 = vmul.f32 1.442695, %v1293_v53  ;;  %v1312_v30 = vmul.f32 1.442695, %v1294_v16  ;;  %v1314_v31 = vmul.f32 1.442695, %v1295_v17 }
 0x2b1   :  { %2860 = vpow2.f32 %v1308_v24  ;;  %v1316_v0 = vmul.f32 1.442695, %v1296_v21  ;;  %v1318_v41 = vmul.f32 1.442695, %v1297_v40  ;;  %v1320_v45 = vmul.f32 1.442695, %v1298_v22 }
 0x2b2   :  { %2862 = vpow2.f32 %v1310_v25  ;;  %v1322_v50 = vmul.f32 1.442695, %v1299_v62 }
 0x2b3   :  { %2864 = vpow2.f32 %v1312_v30 }
 0x2b4   :  { %2866 = vpow2.f32 %v1314_v31 }
 0x2b5   :  { %2868 = vpow2.f32 %v1316_v0 }
 0x2b6   :  { %2870 = vpow2.f32 %v1318_v41 }
 0x2b7   :  { %2872 = vpow2.f32 %v1320_v45 }
 0x2b8   :  { %2874 = vpow2.f32 %v1322_v50 }
 0x2be   :  { %v2861_v54 = vpop.eup %2860 }
 0x2bf   :  { %v2863_v57 = vpop.eup %2862  ;;  %v1392_v60 = vpack.c.bf16 %v2861_v54, %v2861_v54 }
 0x2c0   :  { %v2865_v35 = vpop.eup %2864  ;;  %v1393_v37 = vpack.c.bf16 %v2863_v57, %v2863_v57  ;;  %v1356_v38 = vrot.slane %v2863_v57, 7 }
 0x2c1   :  { %v2867_v39 = vpop.eup %2866  ;;  %2685 = vmatmul.mubr.msk.bf16.vlgmr.msra.gmra.mxu0 %vm1253_vm8, %v1392_v60  ;;  %v1358_v13 = vrot.slane %v2865_v35, 6  ;;  %v1394_v10 = vpack.c.bf16 %v2865_v35, %v2865_v35 }
 0x2c2   :  { %v2869_v48 = vpop.eup %2868  ;;  %2695 = vmatpush3.bf16.msra.mxu0 %v3154_v56  ;;  %2691 = vmatmul.mubr.msk.bf16.vlgmr.msra.gmra.mxu1 %vm1253_vm8, %v1393_v37  ;;  %v1357_v34 = vsel %vm1217_vm1, %v1356_v38, %v2861_v54  ;;  %v1360_v49 = vrot.slane %v2867_v39, 5  ;;  %v1395_v53 = vpack.c.bf16 %v2867_v39, %v2867_v39 }
 0x2c3   :  { %v2871_v9 = vpop.eup %2870  ;;  %2701 = vmatpush3.bf16.msra.mxu1 %v3171_v63  ;;  %2696 = vmatprep.mubr.msk.bf16.mxu0 %vm3036_vm0, %v3035_v19  ;;  %v1359_v55 = vsel %vm1220_vm2, %v1358_v13, %v1357_v34  ;;  %v1362_v47 = vrot.slane %v2869_v48, 4  ;;  %v1396_v40 = vpack.c.bf16 %v2869_v48, %v2869_v48 }
 0x2c4   :  { %v3340_v59 = vpop.eup %2872  ;;  %2706 = vmatprep.subr.bf16.mxu0 %v3035_v19  ;;  %2702 = vmatprep.mubr.msk.bf16.mxu1 %vm3036_vm0, %v3035_v19  ;;  %v1361_v56 = vsel %vm1223_vm3, %v1360_v49, %v1359_v55  ;;  %v1364_v61 = vrot.slane %v2871_v9, 3  ;;  %v1397_v35 = vpack.c.bf16 %v2871_v9, %v2871_v9 }
 0x2c5   :  { %v3346_v3 = vpop.eup %2874  ;;  %2712 = vmatprep.subr.bf16.mxu1 %v3035_v19  ;;  %v1363_v63 = vsel %vm1226_vm4, %v1362_v47, %v1361_v56  ;;  %v1366_v4 = vrot.slane %v3340_v59, 2 }
 0x2c6   :  { %v1365_v7 = vsel %vm1229_vm5, %v1364_v61, %v1363_v63  ;;  %v1368_v8 = vrot.slane %v3346_v3, 1 }
 0x2c7   :  { %v1367_v12 = vsel %vm1232_vm6, %v1366_v4, %v1365_v7 }
 0x2c8   :  { %v1369_v16 = vsel %vm1235_vm7, %v1368_v8, %v1367_v12 }
 0x2c9   :  { %2697 = vmatmul.mubr.msk.bf16.vlgmr.msra.gmra.mxu0 %vm1253_vm8, %v1394_v10  ;;  %v1386_v17 = vsel %vm1253_vm8, %v1369_v16, 0.0 }
 0x2ca   :  { %2707 = vmatpush3.bf16.msra.mxu0 %v3183_v6  ;;  %2703 = vmatmul.mubr.msk.bf16.vlgmr.msra.gmra.mxu1 %vm1253_vm8, %v1395_v53 }
 0x2cb   :  { %2713 = vmatpush3.bf16.msra.mxu1 %v3195_v11  ;;  %1387 = vadd.xlane.f32.xlu1 %v1386_v17  ;;  %v1259_v21 = vpop.xlane.xlu0 %1258 }
 0x2cc   :  { %v1269_v22 = vrot.slane %v1259_v21, 1  ;;  %v1270_v24 = vrot.slane %v1259_v21, 2  ;;  %v1271_v25 = vrot.slane %v1259_v21, 3  ;;  %v1272_v30 = vrot.slane %v1259_v21, 4  ;;  %2708 = vmatprep.mubr.msk.bf16.mxu0 %vm3036_vm0, %v3035_v19  ;;  %2718 = vmatprep.subr.bf16.mxu0 %v3035_v19 }
 0x2cd   :  { %v1273_v31 = vrot.slane %v1259_v21, 5  ;;  %v1274_v62 = vrot.slane %v1259_v21, 6  ;;  %v1275_v0 = vrot.slane %v1259_v21, 7  ;;  %v1300_v6 = vsub.f32 %v3297_v5, %v1259_v21  ;;  %2714 = vmatprep.mubr.msk.bf16.mxu1 %vm3036_vm0, %v3035_v19  ;;  %2724 = vmatprep.subr.bf16.mxu1 %v3035_v19 }
 0x2ce   :  { %v1301_v11 = vsub.f32 %v3288_v44, %v1269_v22  ;;  %v1302_v41 = vsub.f32 %v3294_v2, %v1270_v24  ;;  %v1303_v45 = vsub.f32 %v3291_v52, %v1271_v25  ;;  %v1304_v50 = vsub.f32 %v3306_v14, %v1272_v30  ;;  %v2854_v22 = vld [vmem:[#allocation8 + $0x28] sm:$0xff]   ;;  %v2855_v24 = vld [vmem:[#allocation8 + $0x20] sm:$0xff]   ;;  %v2856_v25 = vld [vmem:[#allocation8 + $0x18] sm:$0xff]  }
 0x2cf   :  { %v1305_v54 = vsub.f32 %v3302_v26, %v1273_v31  ;;  %v1306_v57 = vsub.f32 %v3313_v27, %v1274_v62  ;;  %v1324_v60 = vmul.f32 1.442695, %v1300_v6  ;;  %v1307_v5 = vsub.f32 %v3316_v33, %v1275_v0  ;;  %v2857_v30 = vld [vmem:[#allocation8 + $0x10] sm:$0xff]   ;;  %v2858_v31 = vld [vmem:[#allocation8 + $0x8] sm:$0xff]   ;;  %v2859_v62 = vld [vmem:[#allocation8] sm:$0xff]  }
 0x2d0   :  { %v1326_v37 = vmul.f32 1.442695, %v1301_v11  ;;  %v1328_v38 = vmul.f32 1.442695, %v1302_v41  ;;  %v1330_v39 = vmul.f32 1.442695, %v1303_v45 }
 0x2d1   :  { %2876 = vpow2.f32 %v1324_v60  ;;  %v1332_v13 = vmul.f32 1.442695, %v1304_v50  ;;  %2709 = vmatmul.mubr.msk.bf16.vlgmr.msra.gmra.mxu0 %vm1253_vm8, %v1396_v40  ;;  %v1334_v44 = vmul.f32 1.442695, %v1305_v54  ;;  %v1336_v52 = vmul.f32 1.442695, %v1306_v57 }
 0x2d2   :  { %2878 = vpow2.f32 %v1326_v37  ;;  %2719 = vmatpush3.bf16.msra.mxu0 %v3202_v15  ;;  %2715 = vmatmul.mubr.msk.bf16.vlgmr.msra.gmra.mxu1 %vm1253_vm8, %v1397_v35  ;;  %v1338_v2 = vmul.f32 1.442695, %v1307_v5  ;;  %v1398_v15 = vpack.c.bf16 %v3340_v59, %v3340_v59 }
 0x2d3   :  { %2880 = vpow2.f32 %v1328_v38  ;;  %2725 = vmatpush3.bf16.msra.mxu1 %v3208_v18  ;;  %2720 = vmatprep.mubr.msk.bf16.mxu0 %vm3036_vm0, %v3035_v19  ;;  %v1399_v18 = vpack.c.bf16 %v3346_v3, %v3346_v3 }
 0x2d4   :  { %2882 = vpow2.f32 %v1330_v39  ;;  %2730 = vmatprep.subr.bf16.mxu0 %v3035_v19  ;;  %2726 = vmatprep.mubr.msk.bf16.mxu1 %vm3036_vm0, %v3035_v19 }
 0x2d5   :  { %2884 = vpow2.f32 %v1332_v13  ;;  %2736 = vmatprep.subr.bf16.mxu1 %v3035_v19 }
 0x2d6   :  { %2886 = vpow2.f32 %v1334_v44 }
 0x2d7   :  { %2888 = vpow2.f32 %v1336_v52 }
 0x2d8   :  { %2890 = vpow2.f32 %v1338_v2 }
 0x2d9   :  { %2721 = vmatmul.mubr.msk.bf16.vlgmr.msra.gmra.mxu0 %vm1253_vm8, %v1398_v15 }
 0x2da   :  { %2731 = vmatpush3.bf16.msra.mxu0 %v3106_v20  ;;  %2727 = vmatmul.mubr.msk.bf16.vlgmr.msra.gmra.mxu1 %vm1253_vm8, %v1399_v18 }
 0x2db   :  { %2737 = vmatpush3.bf16.msra.mxu1 %v3214_v23  ;;  %2732 = vmatprep.mubr.msk.bf16.mxu0 %vm3036_vm0, %v3035_v19 }
 0x2dc   :  { %2742 = vmatprep.subr.bf16.mxu0 %v3035_v19  ;;  %2738 = vmatprep.mubr.msk.bf16.mxu1 %vm3036_vm0, %v3035_v19 }
 0x2dd   :  { %2748 = vmatprep.subr.bf16.mxu1 %v3035_v19 }
 0x2de   :  { %v2877_v26 = vpop.eup %2876 }
 0x2df   :  { %v2879_v14 = vpop.eup %2878  ;;  %v1400_v27 = vpack.c.bf16 %v2877_v26, %v2877_v26 }
 0x2e0   :  { %v2881_v33 = vpop.eup %2880  ;;  %v1401_v48 = vpack.c.bf16 %v2879_v14, %v2879_v14  ;;  %v1370_v20 = vrot.slane %v2879_v14, 7 }
 0x2e1   :  { %v2883_v34 = vpop.eup %2882  ;;  %2733 = vmatmul.mubr.msk.bf16.vlgmr.msra.gmra.mxu0 %vm1253_vm8, %v1400_v27  ;;  %v1372_v23 = vrot.slane %v2881_v33, 6  ;;  %v1402_v10 = vpack.c.bf16 %v2881_v33, %v2881_v33 }
 0x2e2   :  { %v2885_v49 = vpop.eup %2884  ;;  %2743 = vmatpush3.bf16.msra.mxu0 %v3143_v51  ;;  %2739 = vmatmul.mubr.msk.bf16.vlgmr.msra.gmra.mxu1 %vm1253_vm8, %v1401_v48  ;;  %v1371_v9 = vsel %vm1217_vm1, %v1370_v20, %v2877_v26  ;;  %v1374_v55 = vrot.slane %v2883_v34, 5  ;;  %v1403_v53 = vpack.c.bf16 %v2883_v34, %v2883_v34 }
 0x2e3   :  { %v2887_v47 = vpop.eup %2886  ;;  %2749 = vmatpush3.bf16.msra.mxu1 %v3223_v28  ;;  %2744 = vmatprep.mubr.msk.bf16.mxu0 %vm3036_vm0, %v3035_v19  ;;  %v1373_v59 = vsel %vm1220_vm2, %v1372_v23, %v1371_v9  ;;  %v1376_v56 = vrot.slane %v2885_v49, 4  ;;  %v1404_v21 = vpack.c.bf16 %v2885_v49, %v2885_v49 }
 0x2e4   :  { %v2889_v61 = vpop.eup %2888  ;;  %2754 = vmatprep.subr.bf16.mxu0 %v3035_v19  ;;  %2750 = vmatprep.mubr.msk.bf16.mxu1 %vm3036_vm0, %v3035_v19  ;;  %v1375_v51 = vsel %vm1223_vm3, %v1374_v55, %v1373_v59  ;;  %v1378_v3 = vrot.slane %v2887_v47, 3  ;;  %v1405_v40 = vpack.c.bf16 %v2887_v47, %v2887_v47 }
 0x2e5   :  { %v2891_v63 = vpop.eup %2890  ;;  %2760 = vmatprep.subr.bf16.mxu1 %v3035_v19  ;;  %v1377_v28 = vsel %vm1226_vm4, %v1376_v56, %v1375_v51  ;;  %v1380_v4 = vrot.slane %v2889_v61, 2 }
 0x2e6   :  { %v1379_v7 = vsel %vm1229_vm5, %v1378_v3, %v1377_v28  ;;  %v1382_v8 = vrot.slane %v2891_v63, 1 }
 0x2e7   :  { %v1381_v12 = vsel %vm1232_vm6, %v1380_v4, %v1379_v7 }
 0x2e8   :  { %v1383_v16 = vsel %vm1235_vm7, %v1382_v8, %v1381_v12 }
 0x2e9   :  { %2745 = vmatmul.mubr.msk.bf16.vlgmr.msra.gmra.mxu0 %vm1253_vm8, %v1402_v10  ;;  %v1389_v17 = vsel %vm1253_vm8, %v1383_v16, 0.0 }
 0x2ea   :  { %2755 = vmatpush3.bf16.msra.mxu0 %v3156_v58  ;;  %2751 = vmatmul.mubr.msk.bf16.vlgmr.msra.gmra.mxu1 %vm1253_vm8, %v1403_v53  ;;  %v1406_v58 = vpack.c.bf16 %v2889_v61, %v2889_v61 }
 0x2eb   :  { %2761 = vmatpush3.bf16.msra.mxu1 %v3229_v32  ;;  %1390 = vadd.xlane.f32.xlu1 %v1389_v17  ;;  %v1407_v32 = vpack.c.bf16 %v2891_v63, %v2891_v63 }
 0x2ec   :  { %2756 = vmatprep.mubr.msk.bf16.mxu0 %vm3036_vm0, %v3035_v19  ;;  %2766 = vmatprep.subr.bf16.mxu0 %v3035_v19 }
 0x2ed   :  { %2762 = vmatprep.mubr.msk.bf16.mxu1 %vm3036_vm0, %v3035_v19  ;;  %2772 = vmatprep.subr.bf16.mxu1 %v3035_v19 }
 0x2f1   :  { %2757 = vmatmul.mubr.msk.bf16.vlgmr.msra.gmra.mxu0 %vm1253_vm8, %v1404_v21 }
 0x2f2   :  { %2767 = vmatpush3.bf16.msra.mxu0 %v3173_v1  ;;  %2763 = vmatmul.mubr.msk.bf16.vlgmr.msra.gmra.mxu1 %vm1253_vm8, %v1405_v40  ;;  %v2852_v1 = vld [vmem:[#allocation8 + $0x38] sm:$0xff]  }
 0x2f3   :  { %2773 = vmatpush3.bf16.msra.mxu1 %v3238_v36  ;;  %2768 = vmatprep.mubr.msk.bf16.mxu0 %vm3036_vm0, %v3035_v19  ;;  %v2853_v36 = vld [vmem:[#allocation8 + $0x30] sm:$0xff]  }
 0x2f4   :  { %2774 = vmatprep.mubr.msk.bf16.mxu1 %vm3036_vm0, %v3035_v19  ;;  %2778 = vmatprep.subr.bf16.mxu0 %v3035_v19 }
 0x2f9   :  { %2769 = vmatmul.mubr.msk.bf16.vlgmr.msra.gmra.mxu0 %vm1253_vm8, %v1406_v58 }
 0x2fa   :  { %2775 = vmatmul.mubr.msk.bf16.vlgmr.msra.gmra.mxu1 %vm1253_vm8, %v1407_v32  ;;  %2794 = vmatprep.mubr.msk.bf16.mxu0 %vm3036_vm0, %v3035_v19 }
 0x2fb   :  { %2779 = vmatpush3.bf16.msra.mxu0 %v2852_v1 }
 0x2fc   :  { %2780 = vmatprep.subr.bf16.mxu0 %v3035_v19 }
 0x2ff   :  { %2781 = vmatpush3.bf16.msra.mxu0 %v2853_v36 }
 0x300   :  { %2782 = vmatprep.subr.bf16.mxu0 %v3035_v19 }
 0x303   :  { %2783 = vmatpush3.bf16.msra.mxu0 %v2854_v22 }
 0x304   :  { %2784 = vmatprep.subr.bf16.mxu0 %v3035_v19 }
 0x307   :  { %2785 = vmatpush3.bf16.msra.mxu0 %v2855_v24 }
 0x308   :  { %2786 = vmatprep.subr.bf16.mxu0 %v3035_v19 }
 0x30b   :  { %2787 = vmatpush3.bf16.msra.mxu0 %v2856_v25 }
 0x30c   :  { %2788 = vmatprep.subr.bf16.mxu0 %v3035_v19 }
 0x30f   :  { %2789 = vmatpush3.bf16.msra.mxu0 %v2857_v30 }
 0x310   :  { %2790 = vmatprep.subr.bf16.mxu0 %v3035_v19 }
 0x313   :  { %2791 = vmatpush3.bf16.msra.mxu0 %v2858_v31 }
 0x314   :  { %2792 = vmatprep.subr.bf16.mxu0 %v3035_v19 }
 0x317   :  { %2793 = vmatpush3.bf16.msra.mxu0 %v2859_v62 }
 0x354   :  { %v1388_v0 = vpop.xlane.xlu1 %1387 }
 0x355   :  { %2892 = vrcp.f32 %v1388_v0 }
 0x362   :  { %v2893_v60 = vpop.eup %2892 }
 0x363   :  { %v2100_v38 = vrot.slane %v2893_v60, 1  ;;  %v2101_v13 = vrot.slane %v2893_v60, 2  ;;  %v2102_v18 = vrot.slane %v2893_v60, 3  ;;  %v2103_v27 = vrot.slane %v2893_v60, 4 }
 0x364   :  { %v2104_v59 = vrot.slane %v2893_v60, 5  ;;  %v2105_v12 = vrot.slane %v2893_v60, 6  ;;  %v2106_v21 = vrot.slane %v2893_v60, 7 }
 0x374   :  { %v1391_v9 = vpop.xlane.xlu1 %1390 }
 0x375   :  { %2894 = vrcp.f32 %v1391_v9 }
 0x381   :  { %v1445_v6 = vpop.f32.mrf.mxu0 }
 0x382   :  { %v1488_v11 = vpop.f32.mrf.mxu1  ;;  %v3456_v55 = vmul.f32 %v2893_v60, %v1445_v6 }
 0x383   :  { %v2686_v41 = vpop.f32.mrf.mxu0  ;;  %v3446_v52 = vmul.f32 %v2100_v38, %v1488_v11 }
 0x384   :  { %v2692_v45 = vpop.f32.mrf.mxu1 }
 0x385   :  { %v1448_v50 = vpop.f32.mrf.mxu0  ;;  %v2389_v33 = vrot.slane %v3446_v52, 7 }
 0x386   :  { %v1491_v54 = vpop.f32.mrf.mxu1 }
 0x387   :  { %v2687_v57 = vpop.f32.mrf.mxu0  ;;  %v2390_v61 = vsel %vm1217_vm1, %v2389_v33, %v3456_v55  ;;  %v3477_v54 = vpop.eup %2894 }
 0x388   :  { %v2693_v35 = vpop.f32.mrf.mxu1  ;;  %v2109_v33 = vrot.slane %v3477_v54, 3 }
 0x389   :  { %v1531_v5 = vpop.f32.mrf.mxu0  ;;  %v2147_v35 = vpack.c.bf16 %v3446_v52, %v3446_v52  ;;  %v2146_v52 = vpack.c.bf16 %v3456_v55, %v3456_v55 }
 0x38a   :  { %v1574_v37 = vpop.f32.mrf.mxu1  ;;  %v3448_v2 = vmul.f32 %v2101_v13, %v1531_v5 }
 0x38b   :  { %v2698_v39 = vpop.f32.mrf.mxu0  ;;  %v3451_v48 = vmul.f32 %v2102_v18, %v1574_v37  ;;  %v2107_v37 = vrot.slane %v3477_v54, 1 }
 0x38c   :  { %v2704_v44 = vpop.f32.mrf.mxu1  ;;  %v2391_v34 = vrot.slane %v3448_v2, 6 }
 0x38d   :  { %v1534_v19 = vpop.f32.mrf.mxu0  ;;  %v2393_v51 = vrot.slane %v3451_v48, 5 }
 0x38e   :  { %v1577_v15 = vpop.f32.mrf.mxu1  ;;  %v2392_v28 = vsel %vm1220_vm2, %v2391_v34, %v2390_v61  ;;  %v2108_v19 = vrot.slane %v3477_v54, 2 }
 0x38f   :  { %v2699_v26 = vpop.f32.mrf.mxu0  ;;  %v2394_v53 = vsel %vm1223_vm3, %v2393_v51, %v2392_v28  ;;  %v2202_v15 = vunpack.c.l.b16 %v2147_v35  ;;  %v2201_v28 = vunpack.c.l.b16 %v2146_v52 }
 0x390   :  { %v2705_v14 = vpop.f32.mrf.mxu1  ;;  %v2148_v26 = vpack.c.bf16 %v3448_v2, %v3448_v2 }
 0x391   :  { %v1617_v20 = vpop.f32.mrf.mxu0 }
 0x392   :  { %v3454_v23 = vmul.f32 %v2103_v27, %v1617_v20  ;;  %v1660_v49 = vpop.f32.mrf.mxu1  ;;  %v2149_v20 = vpack.c.bf16 %v3451_v48, %v3451_v48  ;;  %v2203_v51 = vunpack.c.l.b16 %v2148_v26 }
 0x393   :  { %v2710_v47 = vpop.f32.mrf.mxu0  ;;  %v3461_v3 = vmul.f32 %v2104_v59, %v1660_v49  ;;  %v2217_v59 = vrot.slane %v2202_v15, 7 }
 0x394   :  { %v2716_v56 = vpop.f32.mrf.mxu1  ;;  %v2395_v4 = vrot.slane %v3454_v23, 4 }
 0x395   :  { %v1620_v63 = vpop.f32.mrf.mxu0  ;;  %v2397_v16 = vrot.slane %v3461_v3, 3 }
 0x396   :  { %v1663_v7 = vpop.f32.mrf.mxu1  ;;  %v2396_v40 = vsel %vm1226_vm4, %v2395_v4, %v2394_v53  ;;  %v2204_v4 = vunpack.c.l.b16 %v2149_v20  ;;  %v2111_v53 = vrot.slane %v3477_v54, 5 }
 0x397   :  { %v2711_v8 = vpop.f32.mrf.mxu0  ;;  %v2398_v25 = vsel %vm1229_vm5, %v2397_v16, %v2396_v40  ;;  %v2150_v7 = vpack.c.bf16 %v3454_v23, %v3454_v23  ;;  %v2218_v16 = vsel %vm1217_vm1, %v2217_v59, %v2201_v28 }
 0x398   :  { %v2717_v10 = vpop.f32.mrf.mxu1 }
 0x399   :  { %v1703_v17 = vpop.f32.mrf.mxu0 }
 0x39a   :  { %v3468_v58 = vmul.f32 %v2105_v12, %v1703_v17  ;;  %v1746_v32 = vpop.f32.mrf.mxu1  ;;  %v2110_v12 = vrot.slane %v3477_v54, 4 }
 0x39b   :  { %v2722_v1 = vpop.f32.mrf.mxu0  ;;  %v3470_v36 = vmul.f32 %v2106_v21, %v1746_v32  ;;  %v2112_v32 = vrot.slane %v3477_v54, 6 }
 0x39c   :  { %v2399_v22 = vrot.slane %v3468_v58, 2  ;;  %v2728_v24 = vpop.f32.mrf.mxu1  ;;  %v2219_v1 = vrot.slane %v2203_v51, 6 }
 0x39d   :  { %v2401_v30 = vrot.slane %v3470_v36, 1  ;;  %v1706_v31 = vpop.f32.mrf.mxu0  ;;  %v2153_v26 = vpack.c.bf16 %v3470_v36, %v3470_v36 }
 0x39e   :  { %v1749_v62 = vpop.f32.mrf.mxu1  ;;  %v2400_v0 = vsel %vm1232_vm6, %v2399_v22, %v2398_v25  ;;  %v2205_v31 = vunpack.c.l.b16 %v2150_v7  ;;  %v2220_v15 = vsel %vm1220_vm2, %v2219_v1, %v2218_v16 }
 0x39f   :  { %v2723_v6 = vpop.f32.mrf.mxu0  ;;  %v2402_v11 = vsel %vm1235_vm7, %v2401_v30, %v2400_v0  ;;  %v2221_v30 = vrot.slane %v2204_v4, 5  ;;  %v2151_v62 = vpack.c.bf16 %v3461_v3, %v3461_v3  ;;  %v2208_v7 = vunpack.c.l.b16 %v2153_v26 }
 0x3a0   :  { %v2729_v41 = vpop.f32.mrf.mxu1  ;;  %2419 = vst [vmem:[#allocation11] sm:$0xff] %v2402_v11  ;;  %v2152_v11 = vpack.c.bf16 %v3468_v58, %v3468_v58 }
 0x3a1   :  { %v1789_v45 = vpop.f32.mrf.mxu0  ;;  %v2206_v58 = vunpack.c.l.b16 %v2151_v62 }
 0x3a2   :  { %v1832_v50 = vpop.f32.mrf.mxu1  ;;  %v2138_v2 = vmul.f32 %v3477_v54, %v1789_v45 }
 0x3a3   :  { %v2734_v57 = vpop.f32.mrf.mxu0  ;;  %v2139_v13 = vmul.f32 %v2107_v37, %v1832_v50  ;;  %v2225_v4 = vrot.slane %v2206_v58, 3 }
 0x3a4   :  { %v2740_v60 = vpop.f32.mrf.mxu1  ;;  %v2154_v22 = vpack.c.bf16 %v2138_v2, %v2138_v2 }
 0x3a5   :  { %v1792_v5 = vpop.f32.mrf.mxu0  ;;  %v2155_v49 = vpack.c.bf16 %v2139_v13, %v2139_v13  ;;  %v2403_v17 = vrot.slane %v2139_v13, 7 }
 0x3a6   :  { %v1835_v38 = vpop.f32.mrf.mxu1 }
 0x3a7   :  { %v2735_v39 = vpop.f32.mrf.mxu0  ;;  %v2210_v8 = vunpack.c.l.b16 %v2155_v49  ;;  %v2404_v60 = vsel %vm1217_vm1, %v2403_v17, %v2138_v2 }
 0x3a8   :  { %v2741_v44 = vpop.f32.mrf.mxu1  ;;  %v2209_v39 = vunpack.c.l.b16 %v2154_v22 }
 0x3a9   :  { %v1875_v18 = vpop.f32.mrf.mxu0  ;;  %v2231_v41 = vrot.slane %v2210_v8, 7 }
 0x3aa   :  { %v2140_v14 = vmul.f32 %v2108_v19, %v1875_v18  ;;  %v1918_v27 = vpop.f32.mrf.mxu1  ;;  %v2223_v18 = vrot.slane %v2205_v31, 4 }
 0x3ab   :  { %v2746_v34 = vpop.f32.mrf.mxu0  ;;  %v2141_v9 = vmul.f32 %v2109_v33, %v1918_v27  ;;  %v2207_v27 = vunpack.c.l.b16 %v2152_v11  ;;  %v2232_v33 = vsel %vm1217_vm1, %v2231_v41, %v2209_v39 }
 0x3ac   :  { %v2752_v47 = vpop.f32.mrf.mxu1  ;;  %v2156_v56 = vpack.c.bf16 %v2140_v14, %v2140_v14  ;;  %v2405_v24 = vrot.slane %v2140_v14, 6  ;;  %v2113_v34 = vrot.slane %v3477_v54, 7 }
 0x3ad   :  { %v1878_v61 = vpop.f32.mrf.mxu0  ;;  %v2157_v10 = vpack.c.bf16 %v2141_v9, %v2141_v9  ;;  %v2407_v5 = vrot.slane %v2141_v9, 5  ;;  %v2227_v8 = vrot.slane %v2207_v27, 2 }
 0x3ae   :  { %v1921_v63 = vpop.f32.mrf.mxu1  ;;  %v2211_v21 = vunpack.c.l.b16 %v2156_v56  ;;  %v2406_v13 = vsel %vm1220_vm2, %v2405_v24, %v2404_v60  ;;  %v2222_v61 = vsel %vm1223_vm3, %v2221_v30, %v2220_v15  ;;  %v2229_v30 = vrot.slane %v2208_v7, 1 }
 0x3af   :  { %v2747_v55 = vpop.f32.mrf.mxu0  ;;  %v2212_v45 = vunpack.c.l.b16 %v2157_v10  ;;  %v2408_v9 = vsel %vm1223_vm3, %v2407_v5, %v2406_v13  ;;  %v2224_v28 = vsel %vm1226_vm4, %v2223_v18, %v2222_v61 }
 0x3b0   :  { %v2753_v48 = vpop.f32.mrf.mxu1  ;;  %v2233_v35 = vrot.slane %v2211_v21, 6 }
 0x3b1   :  { %v1961_v40 = vpop.f32.mrf.mxu0  ;;  %v2235_v52 = vrot.slane %v2212_v45, 5 }
 0x3b2   :  { %v2142_v25 = vmul.f32 %v2110_v12, %v1961_v40  ;;  %v2004_v23 = vpop.f32.mrf.mxu1  ;;  %v2234_v49 = vsel %vm1220_vm2, %v2233_v35, %v2232_v33 }
 0x3b3   :  { %v2758_v0 = vpop.f32.mrf.mxu0  ;;  %v2143_v6 = vmul.f32 %v2111_v53, %v2004_v23  ;;  %v2236_v10 = vsel %vm1223_vm3, %v2235_v52, %v2234_v49  ;;  %v2226_v23 = vsel %vm1229_vm5, %v2225_v4, %v2224_v28 }
 0x3b4   :  { %v2158_v50 = vpack.c.bf16 %v2142_v25, %v2142_v25  ;;  %v2764_v57 = vpop.f32.mrf.mxu1  ;;  %v2409_v3 = vrot.slane %v2142_v25, 4 }
 0x3b5   :  { %v2159_v37 = vpack.c.bf16 %v2143_v6, %v2143_v6  ;;  %v1964_v38 = vpop.f32.mrf.mxu0  ;;  %v2411_v59 = vrot.slane %v2143_v6, 3  ;;  %v2228_v6 = vsel %vm1232_vm6, %v2227_v8, %v2226_v23 }
 0x3b6   :  { %v2213_v44 = vunpack.c.l.b16 %v2158_v50  ;;  %v2007_v19 = vpop.f32.mrf.mxu1  ;;  %v2410_v36 = vsel %vm1226_vm4, %v2409_v3, %v2408_v9  ;;  %v2230_v60 = vsel %vm1235_vm7, %v2229_v30, %v2228_v6 }
 0x3b7   :  { %v2759_v14 = vpop.f32.mrf.mxu0  ;;  %v2214_v47 = vunpack.c.l.b16 %v2159_v37  ;;  %v2412_v17 = vsel %vm1229_vm5, %v2411_v59, %v2410_v36 }
 0x3b8   :  { %v2765_v20 = vpop.f32.mrf.mxu1  ;;  %v2237_v51 = vrot.slane %v2213_v44, 4 }
 0x3b9   :  { %v2047_v56 = vpop.f32.mrf.mxu0  ;;  %v2239_v16 = vrot.slane %v2214_v47, 3 }
 0x3ba   :  { %v2144_v2 = vmul.f32 %v2112_v32, %v2047_v56  ;;  %v2090_v63 = vpop.f32.mrf.mxu1  ;;  %v2238_v32 = vsel %vm1226_vm4, %v2237_v51, %v2236_v10 }
 0x3bb   :  { %v2770_v55 = vpop.f32.mrf.mxu0  ;;  %v2145_v54 = vmul.f32 %v2113_v34, %v2090_v63  ;;  %v2240_v45 = vsel %vm1229_vm5, %v2239_v16, %v2238_v32 }
 0x3bc   :  { %v2160_v48 = vpack.c.bf16 %v2144_v2, %v2144_v2  ;;  %v2413_v12 = vrot.slane %v2144_v2, 2  ;;  %v2776_v53 = vpop.f32.mrf.mxu1 }
 0x3bd   :  { %v2161_v21 = vpack.c.bf16 %v2145_v54, %v2145_v54  ;;  %v2415_v40 = vrot.slane %v2145_v54, 1  ;;  %v2050_v1 = vpop.f32.mrf.mxu0 }
 0x3be   :  { %v2215_v22 = vunpack.c.l.b16 %v2160_v48  ;;  %v2093_v24 = vpop.f32.mrf.mxu1  ;;  %v2414_v25 = vsel %vm1232_vm6, %v2413_v12, %v2412_v17 }
 0x3bf   :  { %v2216_v31 = vunpack.c.l.b16 %v2161_v21  ;;  %v2771_v62 = vpop.f32.mrf.mxu0  ;;  %v2416_v0 = vsel %vm1235_vm7, %v2415_v40, %v2414_v25 }
 0x3c0   :  { %v2241_v11 = vrot.slane %v2215_v22, 2  ;;  %v2777_v41 = vpop.f32.mrf.mxu1  ;;  %2420 = vst [vmem:[#allocation11 + $0x8] sm:$0xff] %v2416_v0 }
 0x3c1   :  { %v2243_v50 = vrot.slane %v2216_v31, 1 }
 0x3c2   :  { %v2242_v57 = vsel %vm1232_vm6, %v2241_v11, %v2240_v45 }
 0x3c3   :  { %v2244_v35 = vsel %vm1235_vm7, %v2243_v50, %v2242_v57 }
 0x3c4   :  { %v2245_v5 = vpack.c.b16 %v2244_v35, %v2230_v60 }
 0x3c6   :  { %2795 = vmatmul.mubr.bf16.vlgmr.msra.gmra.mxu0 %v2245_v5 }
 0x3c7   :  { %2987 = shalt.err (!%p2984_p10)
}
 0x3c8   :  { %2444 = dma.vmem_to_hbm [thread:$0]  %s2439_s23, 256, %s3550_s7, [#allocation12], %s3027_s27, %s3027_s27, %s3028_s28  }
 0x3c9   :  { %v2504_v37 = vld [vmem:[%s3548_s5] ss:$0 sm:$0xff]  ;;  %s3039_s8 = smov [#allocation10]  }
 0x3ca   :  { %s2426_s9 = sshll.u32 %s3039_s8, 4  ;;  %s2427_s9 = int_to_ptr.vmem [resolvable:$true] %s2426_s9 }
 0x3cb   :  { %s2996_s7 = scalar_lea.vmem %s2427_s9, 256  ;;  %p3001_p12 = scmp.lt.s32.totalorder %s2427_s9, %s2427_s9 }
 0x3cc   :  { %p2997_p11 = scmp.ne.s32.totalorder %s2427_s9, %s2996_s7  ;;  %p3002_p13 = scmp.lt.s32.totalorder %s2996_s7, %s2996_s7 }
 0x3ce   :  { %p3003_p0 = por %p3002_p13, %p3001_p12 }
 0x3d0   :  { %p3004_p1 = pnand %p3003_p0, %p2997_p11 }
 0x486   :  { %v2329_v38 = vpop.f32.mrf.mxu0 }
 0x487   :  { %v2330_v39 = vadd.f32 %v2504_v37, %v2329_v38 }
 0x488   :  { %v2796_v13 = vpop.f32.mrf.mxu0 }
 0x489   :  { %v2369_v44 = vadd.f32 %v3131_v43, %v2330_v39 }
 0x48a   :  { %v2332_v3 = vpop.f32.mrf.mxu0 }
 0x48b   :  { %2371 = vst [vmem:[#allocation10] sm:$0xff] %v2369_v44  ;;  %v2333_v19 = vadd.f32 %v2504_v37, %v2332_v3 }
 0x48c   :  { %v2797_v15 = vpop.f32.mrf.mxu0 }
 0x48d   :  { %v2370_v18 = vadd.f32 %v2366_v46, %v2333_v19 }
 0x48f   :  { %2372 = vst [vmem:[#allocation10 + $0x8] sm:$0xff] %v2370_v18 }
 0x490   :  { %3007 = shalt.err (!%p3004_p1)
}
 0x491   :  { %2432 = dma.vmem_to_hbm [thread:$0]  %s2427_s9, 256, %s3549_s6, [#allocation4], %s3027_s27, %s3027_s27, %s3028_s28  }
 0x492   :  { %3022 = dma.done.wait [#allocation4], 256  }
 0x493   :  { %3023 = vsyncadd [#allocation4], 4294967040 }
 0x494   :  { %3024 = dma.done.wait [#allocation12], 256  }
 0x495   :  { %3025 = vsyncadd [#allocation12], 4294967040 }
 0x496   :  { %2451 = vsyncpa [#allocation3], 1 }
 0x497   :  { %2452 = vsyncpa [#allocation6], 1 }
 0x498   :  { %2453 = vsyncpa [#allocation9], 1 }
 0x499   :  { %2454 = vsyncpa [#allocation4], 1 }
 0x49a   :  { %2455 = vsyncpa [#allocation12], 1 }

</bundles_post_ra>
